<compile_context>
chip_gen: v6e
topology: v6e:2x2x1
jax: 0.10.0
libtpu: 0.0.40
codegen_flags: <defaults>
</compile_context>

<pallas_src>
import jax
import jax.numpy as jnp
from jax.experimental import pallas as pl
from jax.experimental.pallas import tpu as pltpu


def _round_up(x, m):
    return ((x + m - 1) // m) * m


def _cdiv(a, b):
    return (a + b - 1) // b


def _vmem_capacity_bytes():
    """Physical VMEM per TensorCore; conservative 64 MiB (v7x) fallback."""
    try:
        cap = getattr(pltpu.get_tpu_info(), "vmem_capacity_bytes", None)
        if cap:
            return int(cap)
    except Exception:
        pass
    return 64 * 1024 * 1024


def _pick_tm(M, target):
    """Balanced, 8-aligned token tile.

    * Rebalances so the last tile is not mostly zero padding.
    * Forces >= 2 tiles when M allows so both v7x TensorCores get work.
    """
    target = max(8, min(target, _round_up(M, 8)))
    n_tiles = max(1, _cdiv(M, target))
    if M > 8 and n_tiles == 1:
        n_tiles = 2
    return _round_up(_cdiv(M, n_tiles), 8)


def _resident_vmem_bytes(tm, dim, hidden, xb, wb, ob):
    return (2 * tm * dim * (xb + ob)                      # x / out tiles (2 bufs)
            + 2 * (2 * dim * hidden + hidden + dim) * wb  # W1, W2, b1, b2 (2 bufs)
            + tm * hidden * (4 + wb))                     # f32 SiLU temp + cast copy


def _stream_vmem_bytes(tm, th, dim, xb, wb, ob):
    return (2 * tm * dim * (xb + ob)
            + 2 * (2 * dim * th + th + dim) * wb
            + tm * dim * 4                                # resident f32 accumulator
            + tm * th * (4 + wb))


# ---------------------------------------------------------------------------
# Kernels
# ---------------------------------------------------------------------------

def _ff_kernel_resident(x_ref, w1_ref, b1_ref, w2_ref, b2_ref, o_ref):
    # Full W1/W2 stay VMEM-resident across the token grid (constant index_map
    # -> Pallas skips the re-DMA); only x / out tiles stream from HBM.
    h = jnp.dot(x_ref[...], w1_ref[...], preferred_element_type=jnp.float32)
    h = h + b1_ref[...].astype(jnp.float32)
    h = h * jax.nn.sigmoid(h)                     # SiLU in f32 (EUP sigmoid)
    # Dropout(p=0.0) == identity -> nothing to do.
    y = jnp.dot(h.astype(w2_ref.dtype), w2_ref[...],
                preferred_element_type=jnp.float32)
    o_ref[...] = (y + b2_ref[...].astype(jnp.float32)).astype(o_ref.dtype)


def _ff_kernel_stream(x_ref, w1_ref, b1_ref, w2_ref, b2_ref, o_ref, acc_ref):
    # Grid = (token tiles, hidden tiles); acc_ref is resident across hidden.
    j = pl.program_id(1)

    @pl.when(j == 0)
    def _init():
        acc_ref[...] = jnp.zeros_like(acc_ref)

    h = jnp.dot(x_ref[...], w1_ref[...], preferred_element_type=jnp.float32)
    h = h + b1_ref[...].astype(jnp.float32)
    h = h * jax.nn.sigmoid(h)
    acc_ref[...] += jnp.dot(h.astype(w2_ref.dtype), w2_ref[...],
                            preferred_element_type=jnp.float32)

    @pl.when(j == pl.num_programs(1) - 1)
    def _finalize():
        o_ref[...] = (acc_ref[...] +
                      b2_ref[...].astype(jnp.float32)).astype(o_ref.dtype)


# ---------------------------------------------------------------------------
# Wrapper
# ---------------------------------------------------------------------------

def feedforward_block_pallas(x, w1, b1, w2, b2, *,
                             tm_target=None,
                             th_max=1024,
                             force_hidden_tiling=False,
                             vmem_budget_bytes=None,
                             interpret=False):
    """x: [batch, seq, dim] -> [batch, seq, dim].

    w1: [dim, hidden], b1: [hidden], w2: [hidden, dim], b2: [dim]
    """
    batch, seq, dim = x.shape
    hidden = w1.shape[1]
    assert w1.shape == (dim, hidden) and w2.shape == (hidden, dim)
    assert b1.shape == (hidden,) and b2.shape == (dim,)
    M = batch * seq

    xb = x.dtype.itemsize
    wb = w1.dtype.itemsize
    ob = xb

    capacity = _vmem_capacity_bytes()
    budget = (vmem_budget_bytes if vmem_budget_bytes is not None
              else int(capacity * 0.75))

    # Generation-aware token-tile target: when weights have to be streamed,
    # arithmetic intensity ~ 2*tm / weight_bytes flop/byte, so bigger-VMEM
    # parts (v5e/v6e, 128 MiB) get a bigger tile; 64 MiB parts (v7x) less.
    if tm_target is None:
        tm_target = 1024 if capacity >= (96 << 20) else 512

    tm = _pick_tm(M, tm_target)

    # ---- mode selection: keep W1/W2 VMEM-resident whenever they fit -------
    use_resident = not force_hidden_tiling
    if use_resident:
        cand, chosen = tm, None
        while True:
            if _resident_vmem_bytes(cand, dim, hidden, xb, wb, ob) <= budget:
                chosen = cand
                break
            if cand <= 8:
                break
            cand = max(8, _round_up(cand // 2, 8))
        if chosen is not None and chosen >= min(tm, 128):
            tm = chosen                     # accept a smaller token tile to
        else:                               # keep the weights resident
            use_resident = False

    th = None
    h_pad = hidden
    if not use_resident:
        hidden128 = _round_up(hidden, 128)
        cap = max(128, min(th_max, hidden128))
        cands = sorted({c for c in (128, 256, 512, 1024, hidden128) if c <= cap})
        best = None
        for c in cands:
            if _stream_vmem_bytes(tm, c, dim, xb, wb, ob) > budget:
                continue
            key = (_round_up(hidden, c), -c)   # minimize padding, then prefer big th
            if best is None or key < best[1]:
                best = (c, key)
        th = best[0] if best is not None else 128
        h_pad = _round_up(hidden, th)

    # ---- operand prep ------------------------------------------------------
    m_pad = _round_up(M, tm)
    x2d = x.reshape(M, dim)
    if m_pad != M:
        x2d = jnp.pad(x2d, ((0, m_pad - M), (0, 0)))   # padded rows sliced off below
    b2_2d = b2.reshape(1, dim)

    if use_resident:
        b1_2d = b1.reshape(1, hidden)
        grid = (m_pad // tm,)
        needed = _resident_vmem_bytes(tm, dim, hidden, xb, wb, ob)
        in_specs = [
            pl.BlockSpec((tm, dim), lambda i: (i, 0)),       # x token tile
            pl.BlockSpec((dim, hidden), lambda i: (0, 0)),   # W1 (resident)
            pl.BlockSpec((1, hidden), lambda i: (0, 0)),     # b1 (resident)
            pl.BlockSpec((hidden, dim), lambda i: (0, 0)),   # W2 (resident)
            pl.BlockSpec((1, dim), lambda i: (0, 0)),        # b2 (resident)
        ]
        out_specs = pl.BlockSpec((tm, dim), lambda i: (i, 0))
        scratch = []
        kernel = _ff_kernel_resident
        dim_sem = ("parallel",)
        args = (x2d, w1, b1_2d, w2, b2_2d)
    else:
        # TODO(synk): pre-pad W1/W2/b1 once at init for jit'd production use;
        # per-call jnp.pad re-materializes the weights in HBM every forward.
        w1p, b1p, w2p = w1, b1, w2
        if h_pad != hidden:   # zero-padded hidden units contribute exactly 0
            w1p = jnp.pad(w1, ((0, 0), (0, h_pad - hidden)))
            b1p = jnp.pad(b1, ((0, h_pad - hidden),))
            w2p = jnp.pad(w2, ((0, h_pad - hidden), (0, 0)))
        b1_2d = b1p.reshape(1, h_pad)
        grid = (m_pad // tm, h_pad // th)
        needed = _stream_vmem_bytes(tm, th, dim, xb, wb, ob)
        in_specs = [
            pl.BlockSpec((tm, dim), lambda i, j: (i, 0)),    # x token tile
            pl.BlockSpec((dim, th), lambda i, j: (0, j)),    # W1 hidden slice
            pl.BlockSpec((1, th), lambda i, j: (0, j)),      # b1 hidden slice
            pl.BlockSpec((th, dim), lambda i, j: (j, 0)),    # W2 hidden slice
            pl.BlockSpec((1, dim), lambda i, j: (0, 0)),     # b2 (constant)
        ]
        out_specs = pl.BlockSpec((tm, dim), lambda i, j: (i, 0))
        scratch = [pltpu.VMEM((tm, dim), jnp.float32)]
        kernel = _ff_kernel_stream
        dim_sem = ("parallel", "arbitrary")
        args = (x2d, w1p, b1_2d, w2p, b2_2d)

    # Scoped-VMEM limit from the actual buffer sizes (double buffering already
    # counted in `needed`), with headroom, capped at physical capacity.
    vmem_limit = int(min(max(needed * 1.25 + (4 << 20), 32 << 20), capacity))

    out2d = pl.pallas_call(
        kernel,
        out_shape=jax.ShapeDtypeStruct((m_pad, dim), x.dtype),
        grid_spec=pltpu.PrefetchScalarGridSpec(
            num_scalar_prefetch=0,
            grid=grid,
            in_specs=in_specs,
            out_specs=out_specs,
            scratch_shapes=scratch,
        ),
        compiler_params=pltpu.CompilerParams(
            dimension_semantics=dim_sem,
            vmem_limit_bytes=vmem_limit,
        ),
        interpret=interpret,
    )(*args)

    return out2d[:M].reshape(batch, seq, dim)


# ---------------------------------------------------------------------------
# Reference + tests
# ---------------------------------------------------------------------------

def _reference(x, w1, b1, w2, b2):
    h = jnp.einsum("bsd,dh->bsh", x, w1) + b1
    h = h * jax.nn.sigmoid(h)
    return jnp.einsum("bsh,hd->bsd", h, w2) + b2


def _run_case(key, batch, seq, dim, hidden, tol, **kwargs):
    kx, kw1, kb1, kw2, kb2 = jax.random.split(key, 5)
    x = jax.random.normal(kx, (batch, seq, dim), dtype=jnp.float32)
    w1 = jax.random.normal(kw1, (dim, hidden), dtype=jnp.float32) / jnp.sqrt(dim)
    b1 = jax.random.normal(kb1, (hidden,), dtype=jnp.float32) * 0.01
    w2 = jax.random.normal(kw2, (hidden, dim), dtype=jnp.float32) / jnp.sqrt(hidden)
    b2 = jax.random.normal(kb2, (dim,), dtype=jnp.float32) * 0.01

    out = jax.block_until_ready(
        feedforward_block_pallas(x, w1, b1, w2, b2, **kwargs))
    ref = _reference(x, w1, b1, w2, b2)
    assert out.shape == (batch, seq, dim)
    err = float(jnp.max(jnp.abs(out - ref)))
    assert jnp.allclose(out, ref, atol=tol, rtol=tol), (
        f"mismatch vs reference: max abs err {err}")


if __name__ == "__main__":
    key = jax.random.PRNGKey(0)
    k1, k2, k3 = jax.random.split(key, 3)

    # Small shape matching the module forward ([batch, seq, dim]);
    # exercises the weight-resident path with a tiny dim.
    _run_case(k1, batch=2, seq=8, dim=32, hidden=64, tol=2e-3)

    # Uneven token count (rebalanced tm, padded rows) + non-power-of-two
    # hidden dim; weights still fully VMEM-resident, >=2 token tiles.
    _run_case(k2, batch=2, seq=100, dim=128, hidden=640, tol=2e-3)

    # Force the hidden-tiled streaming path (resident f32 accumulator,
    # multi-step reduction over hidden) to exercise that code path too.
    _run_case(k3, batch=2, seq=64, dim=128, hidden=640, tol=2e-3,
              force_hidden_tiling=True, th_max=256)

    print("KERNEL_OK")
</pallas_src>

<mosaic_0001>
module attributes {stable_mosaic.version = 11 : i64} {
  func.func @_ff_kernel_resident(%arg0: i32, %arg1: memref<8x32xf32, #tpu.memory_space<vmem>>, %arg2: memref<32x64xf32, #tpu.memory_space<vmem>>, %arg3: memref<1x64xf32, #tpu.memory_space<vmem>>, %arg4: memref<64x32xf32, #tpu.memory_space<vmem>>, %arg5: memref<1x32xf32, #tpu.memory_space<vmem>>, %arg6: memref<8x32xf32, #tpu.memory_space<vmem>>) attributes {dimension_semantics = [#tpu.dimension_semantics<parallel>], iteration_bounds = array<i64: 2>, scalar_prefetch = 0 : i64, scratch_operands = 0 : i64, tpu.core_type = #tpu.core_type<tc>, window_params = [{transform_indices = @transform_0, window_bounds = array<i64: 8, 32>}, {pipeline_mode = #tpu.pipeline_mode<synchronous>, transform_indices = @transform_1, window_bounds = array<i64: 32, 64>}, {pipeline_mode = #tpu.pipeline_mode<synchronous>, transform_indices = @transform_2, window_bounds = array<i64: 1, 64>}, {pipeline_mode = #tpu.pipeline_mode<synchronous>, transform_indices = @transform_3, window_bounds = array<i64: 64, 32>}, {pipeline_mode = #tpu.pipeline_mode<synchronous>, transform_indices = @transform_4, window_bounds = array<i64: 1, 32>}, {transform_indices = @transform_5, window_bounds = array<i64: 8, 32>}]} {
    %c0 = arith.constant 0 : index
    %c0_0 = arith.constant 0 : index
    %0 = vector.load %arg1[%c0, %c0_0] : memref<8x32xf32, #tpu.memory_space<vmem>>, vector<8x32xf32>
    %c0_1 = arith.constant 0 : index
    %c0_2 = arith.constant 0 : index
    %1 = vector.load %arg2[%c0_1, %c0_2] : memref<32x64xf32, #tpu.memory_space<vmem>>, vector<32x64xf32>
    %cst = arith.constant dense<0.000000e+00> : vector<8x64xf32>
    %2 = tpu.matmul %0, %1, %cst {dimension_numbers = #tpu.dot_dimension_numbers<[1], [0], [0], [1], [0, 0, 1, 1], [], []>} : vector<8x32xf32>, vector<32x64xf32>, vector<8x64xf32> -> vector<8x64xf32>
    %c0_3 = arith.constant 0 : index
    %c0_4 = arith.constant 0 : index
    %3 = vector.load %arg3[%c0_3, %c0_4] : memref<1x64xf32, #tpu.memory_space<vmem>>, vector<1x64xf32>
    %4 = vector.broadcast %3 : vector<1x64xf32> to vector<8x64xf32>
    %5 = arith.addf %2, %4 : vector<8x64xf32>
    %6 = arith.negf %5 : vector<8x64xf32>
    %7 = math.exp %6 : vector<8x64xf32>
    %cst_5 = arith.constant 1.000000e+00 : f32
    %8 = vector.broadcast %cst_5 : f32 to vector<8x64xf32>
    %9 = arith.addf %8, %7 : vector<8x64xf32>
    %10 = arith.divf %8, %9 : vector<8x64xf32>
    %11 = arith.mulf %5, %10 : vector<8x64xf32>
    %c0_6 = arith.constant 0 : index
    %c0_7 = arith.constant 0 : index
    %12 = vector.load %arg4[%c0_6, %c0_7] : memref<64x32xf32, #tpu.memory_space<vmem>>, vector<64x32xf32>
    %cst_8 = arith.constant dense<0.000000e+00> : vector<8x32xf32>
    %13 = tpu.matmul %11, %12, %cst_8 {dimension_numbers = #tpu.dot_dimension_numbers<[1], [0], [0], [1], [0, 0, 1, 1], [], []>} : vector<8x64xf32>, vector<64x32xf32>, vector<8x32xf32> -> vector<8x32xf32>
    %c0_9 = arith.constant 0 : index
    %c0_10 = arith.constant 0 : index
    %14 = vector.load %arg5[%c0_9, %c0_10] : memref<1x32xf32, #tpu.memory_space<vmem>>, vector<1x32xf32>
    %15 = vector.broadcast %14 : vector<1x32xf32> to vector<8x32xf32>
    %16 = arith.addf %13, %15 : vector<8x32xf32>
    %c0_11 = arith.constant 0 : index
    %c0_12 = arith.constant 0 : index
    %17 = vector.load %arg6[%c0_11, %c0_12] : memref<8x32xf32, #tpu.memory_space<vmem>>, vector<8x32xf32>
    tpu.vector_store %arg6[%c0_11, %c0_12], %16 {strides = array<i32>} : memref<8x32xf32, #tpu.memory_space<vmem>>, vector<8x32xf32>,
    return
  }
  func.func @transform_0(%arg0: i32) -> (i32, i32) {
    %c0_i32 = arith.constant 0 : i32
    %c0_i32_0 = arith.constant 0 : i32
    return %arg0, %c0_i32 : i32, i32
  }
  func.func @transform_1(%arg0: i32) -> (i32, i32) {
    %c0_i32 = arith.constant 0 : i32
    %c0_i32_0 = arith.constant 0 : i32
    %c0_i32_1 = arith.constant 0 : i32
    return %c0_i32, %c0_i32_0 : i32, i32
  }
  func.func @transform_2(%arg0: i32) -> (i32, i32) {
    %c0_i32 = arith.constant 0 : i32
    %c0_i32_0 = arith.constant 0 : i32
    %c0_i32_1 = arith.constant 0 : i32
    return %c0_i32, %c0_i32_0 : i32, i32
  }
  func.func @transform_3(%arg0: i32) -> (i32, i32) {
    %c0_i32 = arith.constant 0 : i32
    %c0_i32_0 = arith.constant 0 : i32
    %c0_i32_1 = arith.constant 0 : i32
    return %c0_i32, %c0_i32_0 : i32, i32
  }
  func.func @transform_4(%arg0: i32) -> (i32, i32) {
    %c0_i32 = arith.constant 0 : i32
    %c0_i32_0 = arith.constant 0 : i32
    %c0_i32_1 = arith.constant 0 : i32
    return %c0_i32, %c0_i32_0 : i32, i32
  }
  func.func @transform_5(%arg0: i32) -> (i32, i32) {
    %c0_i32 = arith.constant 0 : i32
    %c0_i32_0 = arith.constant 0 : i32
    return %arg0, %c0_i32 : i32, i32
  }
}

</mosaic_0001>

<bundles_post_ra>
// kernel: tpu_custom_call.1
= control target key start
LH: loop header
LB: loop body
LE: loop exit
PB: predicated region body
PF: predicated region fallthrough
CT: control target
= control target key end

     0   :  { %10 = vsyncpa [#allocation3], 0  ;;  %s812_s0 = inlined_call_operand.vmem [shape: f32[16,32], index: 0, kind: input, shape index: {}]   ;;  %s813_s1 = inlined_call_operand.vmem [shape: f32[32,64], index: 1, kind: input, shape index: {}]   ;;  %s814_s2 = inlined_call_operand.vmem [shape: f32[1,64], index: 2, kind: input, shape index: {}]   ;;  %s815_s3 = inlined_call_operand.vmem [shape: f32[64,32], index: 3, kind: input, shape index: {}]   ;;  %s816_s4 = inlined_call_operand.vmem [shape: f32[1,32], index: 4, kind: input, shape index: {}]   ;;  %s817_s5 = inlined_call_operand.hbm [shape: f32[16,32], index: 5, kind: output, shape index: {}]  }
   0x1   :  { %12 = vsyncpa [#allocation3 + $0x1], 0  ;;  %s675_s18 = smov 0   ;;  %s677_s19 = smov 0  }
   0x2   :  { %s679_s20 = smov 0   ;;  %s681_s21 = smov 0  }
   0x3 LB: > { %s696_s22 = sadd.s32 4294967295, %s640_s21   ;;  %s476_s23 = sadd.s32 4294967294, %s640_s21   ;;  %s640_s21 = sphi %s681_s21, %s823_s21   ;;  %s636_s20 = sphi %s679_s20, %s822_s20   ;;  %s632_s19 = sphi %s677_s19, %s821_s19   ;;  %s628_s18 = sphi %s675_s18, %s820_s18  }
   0x4   : > { %s700_s24 = sadd.s32 1, %s640_s21   ;;  %s135_s25 = sadd.s32 1, %s636_s20 }
   0x5   : > { %s132_s26 = ssub.s32 %s640_s21, %s700_s24  ;;  %p145_p0 = scmp.ne.s32.totalorder %s636_s20, %s632_s19 }
   0x6   : > { %p133_p1 = scmp.eq.s32.totalorder %s132_s26, 0  ;;  %p146_p2 = scmp.eq.s32.totalorder %s696_s22, 1 }
   0x7   : > { %p151_p3 = scmp.ne.s32.totalorder %s632_s19, %s628_s18  ;;  %p152_p4 = scmp.eq.s32.totalorder %s476_s23, 1 }
   0x8   : > { %s711_s27 = scalar_select %p133_p1, %s636_s20, %s135_s25  }
   0x9   : > { %p713_p5 = por %p146_p2, %p145_p0  ;;  %p717_p6 = por %p152_p4, %p151_p3 }
   0xa   : > { %p479_p7 = scmp.ge.s32.totalorder %s640_s21, 1  ;;  %p189_p8 = scmp.lt.s32.totalorder %s640_s21, 3 }
   0xc   : > { %p190_p9 = pnand %p479_p7, %p189_p8 }
   0xd   : > { %p216_p10 = scmp.lt.s32.totalorder (!%p190_p9), %s696_s22, 1  ;;  %s213_s26 = sand.u32 (!%p190_p9), 1, %s632_s19  }
   0xe   : > { %193 = sbr.rel (%p190_p9) target bundleno = 465 (0x1d1), region = 40  ;;  %s480_s30 = sshll.u32 (!%p190_p9), %s213_s26, 3 }
   0xf   : > { %s488_s8 = sshll.u32 (!%p190_p9), %s696_s22, 7  ;;  %s404_s14 = scalar_lea.sflag (!%p190_p9), [#allocation3], %s213_s26 }
  0x10   : > { %s776_s13 = scalar_lea.hbm (!%p190_p9), %s817_s5, %s488_s8 }
  0x13   : > { %v224_v0 = vld [vmem:[%s813_s1 + $0x18] sm:$0xff]  ;;  %v642_v1 = vmov 0.0   ;;  %v223_v2 = vld [vmem:[%s813_s1 + $0x10] sm:$0xff]  ;;  %vm643_vm0 = vmmov 0   ;;  %s217_s9 = scalar_select %p216_p10, %s696_s22, 1  ;;  %v222_v3 = vld [vmem:[%s813_s1 + $0x8] sm:$0xff] }
  0x14   : > { %505 = vmatprep.subr.mxu0 %v642_v1  ;;  %513 = vmatprep.mubr.msk.f32.mxu0 %vm643_vm0, %v642_v1  ;;  %v221_v4 = vld [vmem:[%s813_s1] sm:$0xff]  ;;  %vm232_vm1 = vcmask 261120   ;;  %v320_v6 = vld [vmem:[%s815_s3 + $0x38] sm:$0xff]  ;;  %v319_v7 = vld [vmem:[%s815_s3 + $0x30] sm:$0xff]  ;;  %vm328_vm2 = vcmask 523264   ;;  %s644_s22 = smov [#allocation2]  }
  0x15   : > { %506 = vmatpush3.msra.mxu0 %v224_v0  ;;  %516 = vmatprep.subr.mxu1 %v642_v1  ;;  %s481_s12 = sshll.u32 %s217_s9, 3  ;;  %v318_v8 = vld [vmem:[%s815_s3 + $0x28] sm:$0xff]  ;;  %v317_v9 = vld [vmem:[%s815_s3 + $0x20] sm:$0xff]  ;;  %v316_v10 = vld [vmem:[%s815_s3 + $0x18] sm:$0xff]  ;;  %s215_s9 = scalar_lea.vmem [#allocation2], %s480_s30 }
  0x16   : > { %507 = vmatprep.subr.mxu0 %v642_v1  ;;  %532 = vmatprep.mubr.msk.f32.mxu1 %vm643_vm0, %v642_v1  ;;  %s219_s17 = scalar_lea.vmem %s812_s0, %s481_s12  ;;  %v315_v11 = vld [vmem:[%s815_s3 + $0x10] sm:$0xff]  ;;  %v314_v12 = vld [vmem:[%s815_s3 + $0x8] sm:$0xff]  ;;  %v313_v13 = vld [vmem:[%s815_s3] sm:$0xff]  ;;  %s417_s10 = sshll.u32 %s215_s9, 4  ;;  %s418_s10 = int_to_ptr.vmem [resolvable:$true] %s417_s10 }
  0x17   : > { %508 = vmatpush3.msra.mxu0 %v223_v2  ;;  %v220_v5 = vld [vmem:[%s219_s17] sm:$0xff]  ;;  %517 = vmatpush3.msra.mxu1 %v320_v6  ;;  %s580_s15 = scalar_lea.vmem %s418_s10, 128  ;;  %s584_s16 = sshll.u32 %s644_s22, 4  ;;  %s585_s16 = int_to_ptr.vmem [resolvable:$false] %s584_s16 }
  0x18   : > { %509 = vmatprep.subr.mxu0 %v642_v1  ;;  %518 = vmatprep.subr.mxu1 %v642_v1  ;;  %v482_v14 = vld [vmem:[%s814_s2] ss:$0 sm:$0xff]  ;;  %p581_p11 = scmp.ne.s32.totalorder %s418_s10, %s580_s15  ;;  %s586_s17 = scalar_lea.vmem %s585_s16, 256 }
  0x19   : > { %510 = vmatpush3.msra.mxu0 %v222_v3  ;;  %519 = vmatpush3.msra.mxu1 %v319_v7  ;;  %v485_v23 = vld [vmem:[%s816_s4] ss:$0 sm:$0xff]  ;;  %p587_p0 = scmp.lt.s32.totalorder %s418_s10, %s585_s16  ;;  %p588_p1 = scmp.lt.s32.totalorder %s586_s17, %s580_s15 }
  0x1a   : > { %511 = vmatprep.subr.mxu0 %v642_v1  ;;  %520 = vmatprep.subr.mxu1 %v642_v1  ;;  %p582_p12 = pnand %p581_p11, %p713_p5 }
  0x1b   : > { %512 = vmatpush3.msra.mxu0 %v221_v4  ;;  %521 = vmatpush3.msra.mxu1 %v318_v8  ;;  %p589_p2 = por %p588_p1, %p587_p0 }
  0x1c   : > { %514 = vmatmul.mubr.msk.f32.vlgmr.msra.gmra.mxu0 %vm232_vm1, %v220_v5  ;;  %522 = vmatprep.subr.mxu1 %v642_v1  ;;  %p583_p13 = pneg %p582_p12 }
  0x1d   : > { %523 = vmatpush3.msra.mxu1 %v317_v9 }
  0x1e   : > { %524 = vmatprep.subr.mxu1 %v642_v1  ;;  %p590_p3 = pnand %p589_p2, %p583_p13 }
  0x1f   : > { %525 = vmatpush3.msra.mxu1 %v316_v10 }
  0x20   : > { %526 = vmatprep.subr.mxu1 %v642_v1 }
  0x21   : > { %527 = vmatpush3.msra.mxu1 %v315_v11 }
  0x22   : > { %528 = vmatprep.subr.mxu1 %v642_v1 }
  0x23   : > { %529 = vmatpush3.msra.mxu1 %v314_v12 }
  0x24   : > { %530 = vmatprep.subr.mxu1 %v642_v1 }
  0x25   : > { %531 = vmatpush3.msra.mxu1 %v313_v13 }
  0xdc   : > { %v302_v15 = vpop.f32.mrf.mxu0 }
  0xdd   : > { %v303_v16 = vadd.f32 %v482_v14, %v302_v15 }
  0xde   : > { %v515_v17 = vpop.f32.mrf.mxu0 }
  0xdf   : > { %v484_v18 = vmul.f32 -1.442695, %v303_v16 }
  0xe1   : > { %576 = vpow2.f32 %v484_v18 }
  0xee   : > { %v577_v19 = vpop.eup %576 }
  0xef   : > { %v309_v20 = vadd.f32 1.0, %v577_v19 }
  0xf1   : > { %578 = vrcp.f32 %v309_v20 }
  0xfe   : > { %v579_v21 = vpop.eup %578 }
  0xff   : > { %v312_v22 = vmul.f32 %v579_v21, %v303_v16 }
 0x101   : > { %533 = vmatmul.mubr.msk.f32.vlgmr.msra.gmra.mxu1 %vm328_vm2, %v312_v22 }
 0x1c1   : > { %v398_v24 = vpop.f32.mrf.mxu1 }
 0x1c2   : > { %v399_v25 = vadd.f32 %v485_v23, %v398_v24 }
 0x1c3   : > { %v534_v26 = vpop.f32.mrf.mxu1 }
 0x1c4   : > { %402 = vst.msk [vmem:[%s215_s9] sm:$0xff] %vm232_vm1, %v399_v25 }
 0x1c5   : > { %593 = shalt.err (!%p590_p3)
}
 0x1c6   : > { %s594_s23 = scalar_lea.hbm %s776_s13, 128  ;;  %s598_s30 = scalar_lea.hbm %s817_s5, 256 }
 0x1c7   : > { %p595_p4 = scmp.ne.s32.totalorder %s776_s13, %s594_s23  ;;  %p599_p9 = scmp.lt.s32.totalorder %s776_s13, %s817_s5 }
 0x1c8   : > { %p600_p10 = scmp.lt.s32.totalorder %s598_s30, %s594_s23 }
 0x1c9   : > { %p596_p7 = pnand %p595_p4, %p713_p5 }
 0x1ca   : > { %p601_p11 = por %p600_p10, %p599_p9 }
 0x1cb   : > { %p597_p8 = pneg %p596_p7 }
 0x1cd   : > { %p602_p12 = pnand %p601_p11, %p597_p8 }
 0x1cf   : > { %605 = shalt.err (!%p602_p12)
}
 0x1d0   : > { %535 = dma.vmem_to_hbm [thread:$0]  (%p713_p5), %s418_s10, 128, %s776_s13, %s404_s14  }
 0x1d1 PF: > { %p541_p13 = scmp.ge.s32.totalorder %s640_s21, 2  ;;  %s429_s8 = sand.u32 1, %s628_s18  }
 0x1d2   : > { %s430_s9 = scalar_lea.sflag [#allocation3], %s429_s8 }
 0x1d3   : > { %p538_p0 = pnand %p541_p13, %p717_p6 }
 0x1d5   : > { %p539_p1 = pneg %p538_p0 }
 0x1d7   : > { %623 = dma.done.wait (%p539_p1), %s430_s9, 128  }
 0x1d8   : > { %625 = vsyncadd (%p539_p1), %s430_s9, 4294967168  ;;  %p15_p2 = scmp.ge.s32.totalorder %s700_s24, 4   ;;  %s820_s18 = smov %s632_s19 }
 0x1d9   : > { %s821_s19 = smov %s636_s20  ;;  %s822_s20 = smov %s711_s27 }
 0x1da   : > { %s823_s21 = smov %s700_s24  ;;  %17 = sbr.rel (!%p15_p2) target bundleno = 3 (0x3), region = 75 }
 0x1df   :  { %435 = vsyncpa [#allocation3], 1 }
 0x1e0   :  { %437 = vsyncpa [#allocation3 + $0x1], 1 }

</bundles_post_ra>
